<compile_context>
chip_gen: v7x
topology: tpu7x:2x2x1
jax: 0.10.0
libtpu: 0.0.40
codegen_flags: <defaults>
</compile_context>

<pallas_src>
import functools

import jax
import jax.numpy as jnp
from jax.experimental import pallas as pl
from jax.experimental.pallas import tpu as pltpu

ALPHA = 1.0
SIGMA = 1.0

_LANES = 128
_SUBLANES = 8
_I8_PACK = 32          # int8 native sublane packing (keep tiles aligned to it)


def _ssd_loss_kernel(pos_ref, mask_ref, neg_ref, ob_ref, gb_ref, out_ref, *,
                     tile_rows, steps_per_core, t_pos, t_neg, t_box):
    c = pl.program_id(0)                     # core-split index ("parallel")
    i = pl.program_id(1)                     # tile step within this split
    g = c * steps_per_core + i               # global tile id handled this step

    @pl.when(i == 0)
    def _init():
        out_ref[...] = jnp.zeros_like(out_ref)

    def _accumulate(contrib):                # contrib: (tile_rows, 128) f32
        # Reduce over the leading (vreg-group) axis only -> pure VPU adds.
        out_ref[...] += jnp.sum(
            contrib.reshape(tile_rows // _SUBLANES, _SUBLANES, _LANES), axis=0)

    # ---- positive classification term: -log p[i, label[i]] ---------------
    @pl.when(g < t_pos)
    def _pos():
        p = pos_ref[...].astype(jnp.float32)
        m = mask_ref[...].astype(jnp.int32)  # int8 one-hot of the labeled class
        _accumulate(jnp.where(m != 0, -jnp.log(p), 0.0))

    # ---- negative classification term: -log p_background -----------------
    @pl.when(g < t_neg)
    def _neg():
        _accumulate(-jnp.log(neg_ref[...].astype(jnp.float32)))

    # ---- smooth-L1 box regression term ------------------------------------
    @pl.when(g < t_box)
    def _box():
        sigma2 = SIGMA * SIGMA
        d = ob_ref[...].astype(jnp.float32) - gb_ref[...].astype(jnp.float32)
        ad = jnp.abs(d)
        y = jnp.where(ad < 1.0 / sigma2, (0.5 * sigma2) * d * d,
                      ad - 0.5 / sigma2)
        _accumulate(ALPHA * y)

    # TODO(synk): tqdm.write side-effect logging (cls_loss / max prob / acc)
    # is host-side printing only and does not affect the returned loss value.


def _pack_lane_dense(flat, tile_rows, pad_value):
    """Pad a 1-D array to whole (tile_rows, 128) tiles and reshape lane-dense."""
    n = flat.shape[0]
    tile_elems = tile_rows * _LANES
    n_tiles = max(1, pl.cdiv(n, tile_elems))
    total = n_tiles * tile_elems
    flat = jnp.pad(flat, (0, total - n), constant_values=pad_value)
    return flat.reshape(n_tiles * tile_rows, _LANES), n_tiles


def ssd_loss(pos_cls, pos_label, neg_cls, out_box, gt_box, *,
             tile_rows=512, core_splits=2):
    """Pallas-backed SSDLoss.forward.

    pos_cls:  [P, C] class probabilities (f32 or bf16)
    pos_label:[P]    int labels in [1, C-1]
    neg_cls:  [N, C] class probabilities (only column 0 is used)
    out_box / gt_box: [P, 4]
    Returns scalar (cls_loss + ALPHA * reg_loss) / P.
    """
    num_pos, n_classes = pos_cls.shape
    if num_pos == 0:                         # mirrors `if num_pos == 0: return 0`
        return jnp.float32(0.0)
    assert tile_rows % _I8_PACK == 0         # keep int8 mask tiles layout-aligned

    # ---- wrapper-side lane-dense repacking (layout plumbing only) ---------
    pos_flat = pos_cls.reshape(-1)
    # int8 one-hot of the labeled class, flattened to match pos_flat layout.
    onehot = (pos_label.astype(jnp.int32)[:, None]
              == jnp.arange(n_classes, dtype=jnp.int32)[None, :])
    mask_flat = onehot.reshape(-1).astype(jnp.int8)
    if neg_cls.shape[0] > 0:
        neg_flat = neg_cls[:, 0]             # ship only the background column
    else:
        # num_neg == 0: negative term is dropped (neutral tile of ones, log 1 = 0)
        neg_flat = jnp.ones((0,), pos_cls.dtype)
    ob_flat = out_box.reshape(-1)
    gb_flat = gt_box.reshape(-1)

    pos_p, t_pos = _pack_lane_dense(pos_flat, tile_rows, 1.0)   # log(1) = 0
    mask_p, _ = _pack_lane_dense(mask_flat, tile_rows, 0)       # 0 -> masked out
    neg_p, t_neg = _pack_lane_dense(neg_flat, tile_rows, 1.0)
    ob_p, t_box = _pack_lane_dense(ob_flat, tile_rows, 0.0)     # diff = 0
    gb_p, _ = _pack_lane_dense(gb_flat, tile_rows, 0.0)

    t_total = max(t_pos, t_neg, t_box)
    steps = pl.cdiv(t_total, core_splits)
    grid = (core_splits, steps)

    def stream_spec(t_s):
        # Clamp past-the-end steps to the last real tile; Pallas skips the DMA
        # when the block index is unchanged, and pl.when skips the compute.
        return pl.BlockSpec(
            (tile_rows, _LANES),
            lambda c, i: (jnp.minimum(c * steps + i, t_s - 1), 0))

    kernel = functools.partial(
        _ssd_loss_kernel, tile_rows=tile_rows, steps_per_core=steps,
        t_pos=t_pos, t_neg=t_neg, t_box=t_box)

    partials = pl.pallas_call(
        kernel,
        out_shape=jax.ShapeDtypeStruct((core_splits * _SUBLANES, _LANES),
                                       jnp.float32),
        grid=grid,
        in_specs=[stream_spec(t_pos), stream_spec(t_pos), stream_spec(t_neg),
                  stream_spec(t_box), stream_spec(t_box)],
        out_specs=pl.BlockSpec((_SUBLANES, _LANES), lambda c, i: (c, 0)),
        compiler_params=pltpu.CompilerParams(
            dimension_semantics=("parallel", "arbitrary")),
    )(pos_p, mask_p, neg_p, ob_p, gb_p)

    # Tiny final cross-lane reduce + divide done once, outside the hot loop.
    return jnp.sum(partials) / jnp.float32(num_pos)


def _reference(pos_cls, pos_label, neg_cls, out_box, gt_box):
    num_pos = pos_cls.shape[0]
    picked = pos_cls[jnp.arange(num_pos), pos_label]
    neg_term = jnp.sum(jnp.log(neg_cls[:, 0])) if neg_cls.shape[0] else 0.0
    cls_loss = -jnp.sum(jnp.log(picked)) - neg_term
    sigma2 = SIGMA * SIGMA
    diff = out_box - gt_box
    abs_diff = jnp.abs(diff)
    y = jnp.where(abs_diff < 1.0 / sigma2, sigma2 / 2.0 * diff ** 2,
                  abs_diff - 0.5 / sigma2)
    reg_loss = jnp.sum(y)
    return (cls_loss + reg_loss * ALPHA) / num_pos


def _run_case(key, num_pos, num_neg, n_classes, tile_rows):
    k1, k2, k3, k4, k5 = jax.random.split(key, 5)
    pos_cls = jax.nn.softmax(jax.random.normal(k1, (num_pos, n_classes)), axis=-1)
    neg_cls = jax.nn.softmax(jax.random.normal(k2, (num_neg, n_classes)), axis=-1)
    pos_label = jax.random.randint(k3, (num_pos,), 1, n_classes, dtype=jnp.int32)
    assert int(pos_label.min()) > 0          # mirrors the module's assertion
    out_box = jax.random.normal(k4, (num_pos, 4), dtype=jnp.float32)
    gt_box = jax.random.normal(k5, (num_pos, 4), dtype=jnp.float32)

    loss = ssd_loss(pos_cls, pos_label, neg_cls, out_box, gt_box,
                    tile_rows=tile_rows)
    loss = jax.block_until_ready(loss)
    ref = _reference(pos_cls, pos_label, neg_cls, out_box, gt_box)
    assert jnp.allclose(loss, ref, rtol=1e-5, atol=1e-5), (loss, ref)


if __name__ == "__main__":
    key = jax.random.PRNGKey(0)
    k_a, k_b = jax.random.split(key)
    # Multi-tile case: exercises grid accumulation across steps, clamped index
    # maps and differing per-stream tile counts (small tile_rows to force
    # several tiles per core split).
    _run_case(k_a, num_pos=960, num_neg=2880, n_classes=16, tile_rows=32)
    # num_neg == 0 path (negative term dropped) with a non-power-of-2 C.
    _run_case(k_b, num_pos=40, num_neg=0, n_classes=21, tile_rows=32)
    print("KERNEL_OK")
</pallas_src>

<mosaic_0001>
module attributes {stable_mosaic.version = 11 : i64} {
  func.func @_ssd_loss_kernel(%arg0: i32, %arg1: i32, %arg2: memref<32x128xf32, #tpu.memory_space<vmem>>, %arg3: memref<32x128xi8, #tpu.memory_space<vmem>>, %arg4: memref<32x128xf32, #tpu.memory_space<vmem>>, %arg5: memref<32x128xf32, #tpu.memory_space<vmem>>, %arg6: memref<32x128xf32, #tpu.memory_space<vmem>>, %arg7: memref<8x128xf32, #tpu.memory_space<vmem>>) attributes {dimension_semantics = [#tpu.dimension_semantics<parallel>, #tpu.dimension_semantics<arbitrary>], iteration_bounds = array<i64: 2, 2>, scalar_prefetch = 0 : i64, scratch_operands = 0 : i64, tpu.core_type = #tpu.core_type<tc>, window_params = [{transform_indices = @transform_0, window_bounds = array<i64: 32, 128>}, {transform_indices = @transform_1, window_bounds = array<i64: 32, 128>}, {transform_indices = @transform_2, window_bounds = array<i64: 32, 128>}, {transform_indices = @transform_3, window_bounds = array<i64: 32, 128>}, {transform_indices = @transform_4, window_bounds = array<i64: 32, 128>}, {transform_indices = @transform_5, window_bounds = array<i64: 8, 128>}]} {
    %c2_i32 = arith.constant 2 : i32
    %0 = arith.muli %arg0, %c2_i32 : i32
    %1 = arith.addi %0, %arg1 : i32
    %c0_i32 = arith.constant 0 : i32
    %2 = arith.cmpi eq, %arg1, %c0_i32 : i32
    %3 = arith.extui %2 : i1 to i32
    %c0_i32_0 = arith.constant 0 : i32
    %4 = arith.cmpi ne, %3, %c0_i32_0 : i32
    scf.if %4 {
      %cst = arith.constant 0.000000e+00 : f32
      %14 = vector.broadcast %cst : f32 to vector<8x128xf32>
      %c0 = arith.constant 0 : index
      %c0_5 = arith.constant 0 : index
      %15 = vector.load %arg7[%c0, %c0_5] : memref<8x128xf32, #tpu.memory_space<vmem>>, vector<8x128xf32>
      tpu.vector_store %arg7[%c0, %c0_5], %14 {strides = array<i32>} : memref<8x128xf32, #tpu.memory_space<vmem>>, vector<8x128xf32>,
    } else {
    }
    %c4_i32 = arith.constant 4 : i32
    %5 = arith.cmpi slt, %1, %c4_i32 : i32
    %6 = arith.extui %5 : i1 to i32
    %c0_i32_1 = arith.constant 0 : i32
    %7 = arith.cmpi ne, %6, %c0_i32_1 : i32
    scf.if %7 {
      %c0 = arith.constant 0 : index
      %c0_5 = arith.constant 0 : index
      %14 = vector.load %arg2[%c0, %c0_5] : memref<32x128xf32, #tpu.memory_space<vmem>>, vector<32x128xf32>
      %c0_6 = arith.constant 0 : index
      %c0_7 = arith.constant 0 : index
      %15 = vector.load %arg3[%c0_6, %c0_7] : memref<32x128xi8, #tpu.memory_space<vmem>>, vector<32x128xi8>
      %16 = arith.extsi %15 : vector<32x128xi8> to vector<32x128xi32>
      %c0_i32_8 = arith.constant 0 : i32
      %17 = vector.broadcast %c0_i32_8 : i32 to vector<32x128xi32>
      %18 = arith.cmpi ne, %16, %17 : vector<32x128xi32>
      %19 = math.log %14 : vector<32x128xf32>
      %cst = arith.constant 0.000000e+00 : f32
      %20 = vector.broadcast %cst : f32 to vector<32x128xf32>
      %21 = arith.subf %20, %19 : vector<32x128xf32>
      %cst_9 = arith.constant 0.000000e+00 : f32
      %22 = vector.broadcast %cst_9 : f32 to vector<32x128xf32>
      %23 = arith.select %18, %21, %22 : vector<32x128xi1>, vector<32x128xf32>
      %c0_10 = arith.constant 0 : index
      %c0_11 = arith.constant 0 : index
      %24 = vector.load %arg7[%c0_10, %c0_11] : memref<8x128xf32, #tpu.memory_space<vmem>>, vector<8x128xf32>
      %25 = vector.shape_cast %23 : vector<32x128xf32> to vector<4x8x128xf32>
      %cst_12 = arith.constant dense<0.000000e+00> : vector<8x128xf32>
      %26 = vector.multi_reduction <add>, %25, %cst_12 [0] : vector<4x8x128xf32> to vector<8x128xf32>
      %27 = arith.addf %24, %26 : vector<8x128xf32>
      %c0_13 = arith.constant 0 : index
      %c0_14 = arith.constant 0 : index
      %28 = vector.load %arg7[%c0_13, %c0_14] : memref<8x128xf32, #tpu.memory_space<vmem>>, vector<8x128xf32>
      tpu.vector_store %arg7[%c0_13, %c0_14], %27 {strides = array<i32>} : memref<8x128xf32, #tpu.memory_space<vmem>>, vector<8x128xf32>,
    } else {
    }
    %c1_i32 = arith.constant 1 : i32
    %8 = arith.cmpi slt, %1, %c1_i32 : i32
    %9 = arith.extui %8 : i1 to i32
    %c0_i32_2 = arith.constant 0 : i32
    %10 = arith.cmpi ne, %9, %c0_i32_2 : i32
    scf.if %10 {
      %c0 = arith.constant 0 : index
      %c0_5 = arith.constant 0 : index
      %14 = vector.load %arg4[%c0, %c0_5] : memref<32x128xf32, #tpu.memory_space<vmem>>, vector<32x128xf32>
      %15 = math.log %14 : vector<32x128xf32>
      %cst = arith.constant 0.000000e+00 : f32
      %16 = vector.broadcast %cst : f32 to vector<32x128xf32>
      %17 = arith.subf %16, %15 : vector<32x128xf32>
      %c0_6 = arith.constant 0 : index
      %c0_7 = arith.constant 0 : index
      %18 = vector.load %arg7[%c0_6, %c0_7] : memref<8x128xf32, #tpu.memory_space<vmem>>, vector<8x128xf32>
      %19 = vector.shape_cast %17 : vector<32x128xf32> to vector<4x8x128xf32>
      %cst_8 = arith.constant dense<0.000000e+00> : vector<8x128xf32>
      %20 = vector.multi_reduction <add>, %19, %cst_8 [0] : vector<4x8x128xf32> to vector<8x128xf32>
      %21 = arith.addf %18, %20 : vector<8x128xf32>
      %c0_9 = arith.constant 0 : index
      %c0_10 = arith.constant 0 : index
      %22 = vector.load %arg7[%c0_9, %c0_10] : memref<8x128xf32, #tpu.memory_space<vmem>>, vector<8x128xf32>
      tpu.vector_store %arg7[%c0_9, %c0_10], %21 {strides = array<i32>} : memref<8x128xf32, #tpu.memory_space<vmem>>, vector<8x128xf32>,
    } else {
    }
    %c1_i32_3 = arith.constant 1 : i32
    %11 = arith.cmpi slt, %1, %c1_i32_3 : i32
    %12 = arith.extui %11 : i1 to i32
    %c0_i32_4 = arith.constant 0 : i32
    %13 = arith.cmpi ne, %12, %c0_i32_4 : i32
    scf.if %13 {
      %c0 = arith.constant 0 : index
      %c0_5 = arith.constant 0 : index
      %14 = vector.load %arg5[%c0, %c0_5] : memref<32x128xf32, #tpu.memory_space<vmem>>, vector<32x128xf32>
      %c0_6 = arith.constant 0 : index
      %c0_7 = arith.constant 0 : index
      %15 = vector.load %arg6[%c0_6, %c0_7] : memref<32x128xf32, #tpu.memory_space<vmem>>, vector<32x128xf32>
      %16 = arith.subf %14, %15 : vector<32x128xf32>
      %17 = math.absf %16 : vector<32x128xf32>
      %cst = arith.constant 1.000000e+00 : f32
      %18 = vector.broadcast %cst : f32 to vector<32x128xf32>
      %19 = arith.cmpf olt, %17, %18 : vector<32x128xf32>
      %cst_8 = arith.constant 5.000000e-01 : f32
      %20 = vector.broadcast %cst_8 : f32 to vector<32x128xf32>
      %21 = arith.mulf %20, %16 : vector<32x128xf32>
      %22 = arith.mulf %21, %16 : vector<32x128xf32>
      %cst_9 = arith.constant 5.000000e-01 : f32
      %23 = vector.broadcast %cst_9 : f32 to vector<32x128xf32>
      %24 = arith.subf %17, %23 : vector<32x128xf32>
      %25 = arith.select %19, %22, %24 : vector<32x128xi1>, vector<32x128xf32>
      %cst_10 = arith.constant 1.000000e+00 : f32
      %26 = vector.broadcast %cst_10 : f32 to vector<32x128xf32>
      %27 = arith.mulf %26, %25 : vector<32x128xf32>
      %c0_11 = arith.constant 0 : index
      %c0_12 = arith.constant 0 : index
      %28 = vector.load %arg7[%c0_11, %c0_12] : memref<8x128xf32, #tpu.memory_space<vmem>>, vector<8x128xf32>
      %29 = vector.shape_cast %27 : vector<32x128xf32> to vector<4x8x128xf32>
      %cst_13 = arith.constant dense<0.000000e+00> : vector<8x128xf32>
      %30 = vector.multi_reduction <add>, %29, %cst_13 [0] : vector<4x8x128xf32> to vector<8x128xf32>
      %31 = arith.addf %28, %30 : vector<8x128xf32>
      %c0_14 = arith.constant 0 : index
      %c0_15 = arith.constant 0 : index
      %32 = vector.load %arg7[%c0_14, %c0_15] : memref<8x128xf32, #tpu.memory_space<vmem>>, vector<8x128xf32>
      tpu.vector_store %arg7[%c0_14, %c0_15], %31 {strides = array<i32>} : memref<8x128xf32, #tpu.memory_space<vmem>>, vector<8x128xf32>,
    } else {
    }
    return
  }
  func.func @transform_0(%arg0: i32, %arg1: i32) -> (i32, i32) {
    %c2_i32 = arith.constant 2 : i32
    %0 = arith.muli %arg0, %c2_i32 : i32
    %1 = arith.addi %0, %arg1 : i32
    %c3_i32 = arith.constant 3 : i32
    %2 = arith.minsi %1, %c3_i32 : i32
    %c0_i32 = arith.constant 0 : i32
    %c0_i32_0 = arith.constant 0 : i32
    return %2, %c0_i32 : i32, i32
  }
  func.func @transform_1(%arg0: i32, %arg1: i32) -> (i32, i32) {
    %c2_i32 = arith.constant 2 : i32
    %0 = arith.muli %arg0, %c2_i32 : i32
    %1 = arith.addi %0, %arg1 : i32
    %c3_i32 = arith.constant 3 : i32
    %2 = arith.minsi %1, %c3_i32 : i32
    %c0_i32 = arith.constant 0 : i32
    %c0_i32_0 = arith.constant 0 : i32
    return %2, %c0_i32 : i32, i32
  }
  func.func @transform_2(%arg0: i32, %arg1: i32) -> (i32, i32) {
    %c2_i32 = arith.constant 2 : i32
    %0 = arith.muli %arg0, %c2_i32 : i32
    %1 = arith.addi %0, %arg1 : i32
    %c0_i32 = arith.constant 0 : i32
    %2 = arith.minsi %1, %c0_i32 : i32
    %c0_i32_0 = arith.constant 0 : i32
    %c0_i32_1 = arith.constant 0 : i32
    return %2, %c0_i32_0 : i32, i32
  }
  func.func @transform_3(%arg0: i32, %arg1: i32) -> (i32, i32) {
    %c2_i32 = arith.constant 2 : i32
    %0 = arith.muli %arg0, %c2_i32 : i32
    %1 = arith.addi %0, %arg1 : i32
    %c0_i32 = arith.constant 0 : i32
    %2 = arith.minsi %1, %c0_i32 : i32
    %c0_i32_0 = arith.constant 0 : i32
    %c0_i32_1 = arith.constant 0 : i32
    return %2, %c0_i32_0 : i32, i32
  }
  func.func @transform_4(%arg0: i32, %arg1: i32) -> (i32, i32) {
    %c2_i32 = arith.constant 2 : i32
    %0 = arith.muli %arg0, %c2_i32 : i32
    %1 = arith.addi %0, %arg1 : i32
    %c0_i32 = arith.constant 0 : i32
    %2 = arith.minsi %1, %c0_i32 : i32
    %c0_i32_0 = arith.constant 0 : i32
    %c0_i32_1 = arith.constant 0 : i32
    return %2, %c0_i32_0 : i32, i32
  }
  func.func @transform_5(%arg0: i32, %arg1: i32) -> (i32, i32) {
    %c0_i32 = arith.constant 0 : i32
    %c0_i32_0 = arith.constant 0 : i32
    return %arg0, %c0_i32 : i32, i32
  }
}

</mosaic_0001>

<bundles_post_ra>
// kernel: tpu_custom_call.1
= control target key start
LH: loop header
LB: loop body
LE: loop exit
PB: predicated region body
PF: predicated region fallthrough
CT: control target
= control target key end

     0   :  { %s1824_s0 = inlined_call_operand.hbm [shape: f32[128,128], index: 0, kind: input, shape index: {}]   ;;  %s1825_s1 = inlined_call_operand.hbm [shape: s8[128,128], index: 1, kind: input, shape index: {}]   ;;  %s1826_s2 = inlined_call_operand.hbm [shape: f32[32,128], index: 2, kind: input, shape index: {}]   ;;  %s1827_s3 = inlined_call_operand.hbm [shape: f32[32,128], index: 3, kind: input, shape index: {}]   ;;  %s1828_s4 = inlined_call_operand.hbm [shape: f32[32,128], index: 4, kind: input, shape index: {}]   ;;  %s1829_s5 = inlined_call_operand.hbm [shape: f32[16,128], index: 5, kind: output, shape index: {}]  }
   0x1   :  { %1856 = sst [smem:[#allocation32_spill]] %s1825_s1 }
   0x2   :  { %1857 = sst [smem:[#allocation33_spill]] %s1829_s5 }
   0x3   :  { %10 = vsyncpa [#allocation3], 0 }
   0x4   :  { %12 = vsyncpa [#allocation3 + $0x1], 0 }
   0x5   :  { %13 = vsyncpa [#allocation6], 0 }
   0x6   :  { %15 = vsyncpa [#allocation6 + $0x1], 0 }
   0x7   :  { %16 = vsyncpa [#allocation9], 0 }
   0x8   :  { %18 = vsyncpa [#allocation9 + $0x1], 0 }
   0x9   :  { %19 = vsyncpa [#allocation4], 0 }
   0xa   :  { %21 = vsyncpa [#allocation4 + $0x1], 0  ;;  %s1352_s18 = smov 0   ;;  %s1354_s19 = smov 0  }
   0xb   :  { %s1356_s20 = smov 0   ;;  %s1358_s21 = smov 0  }
   0xc   :  { %s1360_s22 = smov 0   ;;  %s1362_s23 = smov 0  }
   0xd   :  { %s1364_s24 = smov 0   ;;  %s1366_s25 = smov 0  }
   0xe   :  { %s1368_s26 = smov 0   ;;  %s1370_s27 = smov 0  }
   0xf   :  { %s1372_s28 = smov 0   ;;  %s1374_s29 = smov 0  }
  0x10   :  { %s1376_s30 = smov 0  }
  0x11 LB: > { %1858 = sst [smem:[#allocation17_spill]] %s1263_s18  ;;  %s1418_s6 = sadd.s32 4294967295, %s1311_s30   ;;  %s1311_s30 = sphi %s1376_s30, %s27_s30   ;;  %s1307_s29 = sphi %s1374_s29, %s1925_s29   ;;  %s1303_s28 = sphi %s1372_s28, %s1924_s28   ;;  %s1299_s27 = sphi %s1370_s27, %s1923_s27   ;;  %s1295_s26 = sphi %s1368_s26, %s1922_s26   ;;  %s1291_s25 = sphi %s1366_s25, %s1921_s25   ;;  %s1287_s24 = sphi %s1364_s24, %s1928_s24   ;;  %s1283_s23 = sphi %s1362_s23, %s1927_s23   ;;  %s1279_s22 = sphi %s1360_s22, %s1797_s22   ;;  %s1275_s21 = sphi %s1358_s21, %s1926_s21   ;;  %s1271_s20 = sphi %s1356_s20, %s1919_s20   ;;  %s1267_s19 = sphi %s1354_s19, %s1918_s19   ;;  %s1263_s18 = sphi %s1352_s18, %s1917_s18  }
  0x12   : > { %1859 = sst [smem:[#allocation18_spill]] %s1267_s19  ;;  %s36_s8 = sadd.s32 1, %s1303_s28 }
  0x13   : > { %1860 = sst [smem:[#allocation19_spill]] %s1271_s20  ;;  %s39_s9 = sadd.s32 1, %s1307_s29 }
  0x14   : > { %1861 = sst [smem:[#allocation20_spill]] %s1291_s25  ;;  %p37_p0 = scmp.ge.s32.totalorder %s36_s8, 2 }
  0x15   : > { %1862 = sst [smem:[#allocation21_spill]] %s1295_s26  ;;  %s787_s10 = sshll.u32 %s1307_s29, 1 }
  0x16   : > { %1863 = sst [smem:[#allocation22_spill]] %s1299_s27  ;;  %s44_s11 = sadd.s32 %s1303_s28, %s787_s10 }
  0x17   : > { %1864 = sst [smem:[#allocation23_spill]] %s1303_s28  ;;  %s54_s12 = sadd.s32 1, %s1291_s25 }
  0x18   : > { %1865 = sst [smem:[#allocation24_spill]] %s1307_s29  ;;  %s1930_s8 = smov (%p37_p0, %s36_s8), 0 }
  0x19   : > { %1866 = sst [smem:[#allocation25_spill]] %s1311_s30  ;;  %s1932_s9 = smov (!%p37_p0, %s39_s9), %s1307_s29 }
  0x1a   : > { %1867 = sst [smem:[#allocation26_spill]] %s1930_s8  ;;  %p45_p1 = scmp.lt.s32.totalorder %s44_s11, 3 }
  0x1b   : > { %p61_p2 = scmp.ne.s32.totalorder %s1291_s25, %s1287_s24  ;;  %p41_p3 = scmp.ge.s32.totalorder %s1932_s9, 2 }
  0x1c   : > { %p62_p4 = scmp.eq.s32.totalorder %s1311_s30, 0  ;;  %s1934_s11 = smov (!%p45_p1, %s44_s11), 3 }
  0x1d   : > { %s1936_s9 = smov (%p41_p3, %s1932_s9), 0  ;;  %p67_p6 = scmp.ne.s32.totalorder %s1287_s24, %s1283_s23 }
  0x1e   : > { %1868 = sst [smem:[#allocation27_spill]] %s1936_s9  ;;  %p1436_p5 = por %p62_p4, %p61_p2 }
  0x1f   : > { %s788_s14 = sshll.u32 %s1936_s9, 1  ;;  %p68_p7 = scmp.eq.s32.totalorder %s1418_s6, 0 }
  0x20   : > { %s48_s15 = sadd.s32 %s788_s14, %s1930_s8  ;;  %p1260_p8 = scmp.ne.s32.totalorder %s1279_s22, 0 }
  0x21   : > { %p49_p9 = scmp.lt.s32.totalorder %s48_s15, 3  ;;  %p1446_p10 = por %p68_p7, %p67_p6 }
  0x22   : > { %p1450_p11 = por %p1260_p8, %p62_p4  ;;  %p135_p12 = scmp.ne.s32.totalorder %s1279_s22, %s1275_s21 }
  0x23   : > { %s1870_s16 = scalar_select %p1446_p10, 1, 0 }
  0x24   : > { %s1938_s15 = smov (!%p49_p9, %s48_s15), 3  ;;  %p1456_p13 = por %p135_p12, %p68_p7 }
  0x25   : > { %s213_s10 = ssub.s32 %s1307_s29, %s1936_s9  ;;  %s51_s14 = ssub.s32 %s1934_s11, %s1938_s15 }
  0x26   : > { %s1872_s23 = scalar_select %p1456_p13, 1, 0 }
  0x27   : > { %p214_p0 = scmp.eq.s32.totalorder %s213_s10, 0  ;;  %p52_p1 = scmp.eq.s32.totalorder %s51_s14, 0 }
  0x28   : > { %s216_s7 = sadd.s32 1, %s1271_s20  ;;  %p226_p2 = scmp.ne.s32.totalorder %s1271_s20, %s1267_s19 }
  0x29   : > { %s1465_s8 = scalar_select %p214_p0, %s1271_s20, %s216_s7  }
  0x2a   : > { %s1468_s28 = scalar_select %p52_p1, %s1291_s25, %s54_s12  }
  0x2b   : > { %1873 = sst [smem:[#allocation28_spill]] %s1465_s8  ;;  %p227_p3 = scmp.eq.s32.totalorder %s1418_s6, 3 }
  0x2c   : > { %1874 = sst [smem:[#allocation29_spill]] %s1468_s28  ;;  %p232_p4 = scmp.ne.s32.totalorder %s1267_s19, %s1263_s18 }
  0x2d   : > { %s1875_s21 = sadd.s32 4294967294, %s1311_s30   ;;  %p1477_p7 = por %p227_p3, %p226_p2 }
  0x2e   : > { %p233_p6 = scmp.eq.s32.totalorder %s1875_s21, 3  ;;  %p1837_p9 = scmp.lt.s32.totalorder %s1311_s30, 4 }
  0x2f   : > { %s1876_s5 = scalar_select %p1477_p7, 1, 0 }
  0x30   : > { %p1481_p8 = por %p233_p6, %p232_p4  ;;  %s1487_s10 = sand.u32 1, %s1291_s25  }
  0x31   : > { %1877 = sst [smem:[#allocation30_spill]] %s1876_s5  ;;  %s1839_s7 = sand.u32 1, %s1311_s30  }
  0x32   : > { %s1878_s15 = scalar_select %p1481_p8, 1, 0 }
  0x33   : > { %p1495_p12 = pnand %p1837_p9, %p1436_p5  ;;  %s803_s21 = sshll.u32 %s1487_s10, 3 }
  0x34   : > { %1879 = sst [smem:[#allocation31_spill]] %s1878_s15  ;;  %s805_s9 = sshll.u32 %s1934_s11, 7 }
  0x35   : > { %s1880_s14 = scalar_select %p1495_p12, 1, 0 }
  0x36   : > { %s282_s29 = scalar_lea.vmem [#allocation5], %s803_s21  ;;  %s1881_s1 = sld [smem:[#allocation32_spill]] }
  0x37   : > { %s293_s28 = sshll.u32 %s282_s29, 4  ;;  %s1510_s13 = scalar_lea.sflag [#allocation6], %s1839_s7  ;;  %s1506_s28 = int_to_ptr.vmem [resolvable:$true] %s293_s28 }
  0x38   : > { %p1843_p0 = pneg %p1495_p12 }
  0x3c   : > { %s1504_s25 = scalar_lea.hbm %s1881_s1, %s805_s9  ;;  %s1011_s8 = scalar_lea.hbm %s1881_s1, 512 }
  0x3d   : > { %s1006_s12 = scalar_lea.hbm %s1504_s25, 128  ;;  %p1012_p3 = scmp.lt.u32.totalorder %s1504_s25, %s1881_s1 }
  0x3e   : > { %p1007_p5 = scmp.ne.s32.totalorder %s1504_s25, %s1006_s12  ;;  %p1013_p4 = scmp.lt.u32.totalorder %s1011_s8, %s1006_s12 }
  0x3f   : > { %p1015_p9 = scmp.lt.u32.totalorder %s1006_s12, %s1504_s25 }
  0x40   : > { %p1009_p1 = pnand %p1843_p0, %p1007_p5  ;;  %p1014_p6 = por %p1013_p4, %p1012_p3 }
  0x42   : > { %p1010_p2 = pneg %p1009_p1  ;;  %p1016_p8 = por %p1015_p9, %p1014_p6 }
  0x44   : > { %p1017_p7 = pnand %p1016_p8, %p1010_p2 }
  0x46   : > { %1020 = shalt.err (!%p1017_p7)
}
  0x47   : > { %s1021_s7 = scalar_lea.vmem %s1506_s28, 128  ;;  %s1313_s20 = smov [#allocation5]  }
  0x48   : > { %p1022_p5 = scmp.ne.s32.totalorder %s1506_s28, %s1021_s7  ;;  %s1026_s29 = sshll.u32 %s1313_s20, 4  ;;  %s1027_s29 = int_to_ptr.vmem [resolvable:$false] %s1026_s29 }
  0x49   : > { %s1028_s9 = scalar_lea.vmem %s1027_s29, 256  ;;  %p1029_p10 = scmp.lt.s32.totalorder %s1506_s28, %s1027_s29 }
  0x4a   : > { %p1024_p1 = pnand %p1022_p5, %p1843_p0  ;;  %p1030_p3 = scmp.lt.s32.totalorder %s1028_s9, %s1021_s7 }
  0x4c   : > { %p1025_p13 = pneg %p1024_p1  ;;  %p1031_p4 = por %p1030_p3, %p1029_p10 }
  0x4e   : > { %p1032_p9 = pnand %p1031_p4, %p1025_p13 }
  0x50   : > { %1035 = shalt.err (!%p1032_p9)
}
  0x51   : > { %859 = dma.hbm_to_vmem [thread:$0]  (!%p1495_p12), %s1504_s25, 128, %s1506_s28, %s1510_s13  }
  0x52   : > { %p1882_p7 = scmp.lt.s32.totalorder %s1311_s30, 4  ;;  %p818_p10 = scmp.ge.s32.totalorder %s1311_s30, 1 }
  0x53   : > { %p373_p13 = scmp.lt.s32.totalorder %s1311_s30, 5  ;;  %s1314_s8 = smov [#allocation8]  }
  0x54   : > { %p1542_p8 = pnand %p1882_p7, %p1450_p11  ;;  %s340_s21 = sshll.u32 %s1314_s8, 4  ;;  %s341_s21 = int_to_ptr.vmem [resolvable:$true] %s340_s21 }
  0x55   : > { %p1548_p2 = pnand %p818_p10, %p373_p13  ;;  %s1885_s20 = sand.u32 1, %s1311_s30  }
  0x56   : > { %s1883_s12 = scalar_select %p1542_p8, 1, 0 }
  0x57   : > { %s1884_s7 = scalar_select %p1548_p2, 1, 0 }
  0x58   : > { %s1554_s29 = scalar_lea.sflag [#allocation9], %s1885_s20  ;;  %s1036_s17 = scalar_lea.hbm %s1827_s3, 512 }
  0x59   : > { %p1037_p11 = scmp.ne.s32.totalorder %s1827_s3, %s1036_s17  ;;  %p1564_p6 = pneg %p1542_p8 }
  0x5a   : > { %p1043_p3 = scmp.lt.u32.totalorder %s1036_s17, %s1036_s17  ;;  %p1045_p4 = scmp.lt.u32.totalorder %s1036_s17, %s1827_s3 }
  0x5b   : > { %p1039_p5 = pnand %p1564_p6, %p1037_p11 }
  0x5c   : > { %p1046_p9 = por %p1045_p4, %p1043_p3 }
  0x5d   : > { %p1040_p1 = pneg %p1039_p5 }
  0x5f   : > { %p1047_p7 = pnand %p1046_p9, %p1040_p1 }
  0x61   : > { %1050 = shalt.err (!%p1047_p7)
}
  0x62   : > { %s1051_s25 = scalar_lea.vmem %s341_s21, 512  ;;  %s1058_s1 = scalar_lea.vmem %s341_s21, 1024 }
  0x63   : > { %p1052_p10 = scmp.ne.s32.totalorder %s341_s21, %s1051_s25  ;;  %p1059_p2 = scmp.lt.s32.totalorder %s341_s21, %s341_s21 }
  0x64   : > { %p1060_p12 = scmp.lt.s32.totalorder %s1058_s1, %s1051_s25 }
  0x65   : > { %p1054_p13 = pnand %p1052_p10, %p1564_p6 }
  0x66   : > { %p1061_p8 = por %p1060_p12, %p1059_p2 }
  0x67   : > { %p1055_p0 = pneg %p1054_p13 }
  0x69   : > { %p1062_p11 = pnand %p1061_p8, %p1055_p0 }
  0x6b   : > { %1065 = shalt.err (!%p1062_p11)
}
  0x6c   : > { %s1315_s28 = smov 128   ;;  %s1316_s17 = smov 8  }
  0x6d   : > { %p1887_p5 = scmp.ne.s32.totalorder %s1883_s12, 0  ;;  %s837_s20 = sshll.u32 %s1934_s11, 9 }
  0x6e   : > { %s1888_s25 = sshll.u32 %s1487_s10, 5  ;;  %s1590_s26 = scalar_lea.hbm %s1824_s0, %s837_s20 }
  0x6f   : > { %865 = dma.hbm_to_vmem [thread:$0]  (!%p1887_p5), %s1827_s3, 512, %s341_s21, %s1554_s29, %s1315_s28, %s1315_s28, %s1316_s17  }
  0x70   : > { %s257_s1 = scalar_lea.vmem [#allocation2], %s1888_s25  ;;  %s254_s27 = scalar_lea.sflag [#allocation3], %s1487_s10 }
  0x71   : > { %s268_s18 = sshll.u32 %s257_s1, 4  ;;  %s1066_s19 = scalar_lea.hbm %s1590_s26, 512  ;;  %s1592_s18 = int_to_ptr.vmem [resolvable:$true] %s268_s18 }
  0x72   : > { %p1067_p12 = scmp.ne.s32.totalorder %s1590_s26, %s1066_s19  ;;  %p1889_p0 = scmp.ne.s32.totalorder %s1880_s14, 0 }
  0x73   : > { %s1071_s9 = scalar_lea.hbm %s1824_s0, 2048  ;;  %p1072_p3 = scmp.lt.u32.totalorder %s1590_s26, %s1824_s0 }
  0x74   : > { %p1890_p8 = pneg %p1889_p0  ;;  %p1073_p4 = scmp.lt.u32.totalorder %s1071_s9, %s1066_s19 }
  0x75   : > { %p1075_p7 = scmp.lt.u32.totalorder %s1066_s19, %s1590_s26 }
  0x76   : > { %p1069_p2 = pnand %p1067_p12, %p1890_p8  ;;  %p1074_p9 = por %p1073_p4, %p1072_p3 }
  0x78   : > { %p1070_p1 = pneg %p1069_p2  ;;  %p1076_p10 = por %p1075_p7, %p1074_p9 }
  0x7a   : > { %p1077_p13 = pnand %p1076_p10, %p1070_p1 }
  0x7c   : > { %1080 = shalt.err (!%p1077_p13)
}
  0x7d   : > { %s1081_s8 = scalar_lea.vmem %s1592_s18, 512  ;;  %p1891_p12 = pmov %p1890_p8 }
  0x7e   : > { %p1082_p11 = scmp.ne.s32.totalorder %s1592_s18, %s1081_s8  ;;  %s1317_s20 = smov [#allocation2]  }
  0x7f   : > { %s1086_s25 = sshll.u32 %s1317_s20, 4  ;;  %s1087_s25 = int_to_ptr.vmem [resolvable:$false] %s1086_s25 }
  0x80   : > { %p1084_p8 = pnand %p1082_p11, %p1891_p12  ;;  %s1088_s1 = scalar_lea.vmem %s1087_s25, 1024 }
  0x81   : > { %p1089_p5 = scmp.lt.s32.totalorder %s1592_s18, %s1087_s25  ;;  %p1090_p3 = scmp.lt.s32.totalorder %s1088_s1, %s1081_s8 }
  0x82   : > { %p1085_p2 = pneg %p1084_p8 }
  0x83   : > { %p1091_p4 = por %p1090_p3, %p1089_p5 }
  0x85   : > { %p1092_p9 = pnand %p1091_p4, %p1085_p2 }
  0x87   : > { %1095 = shalt.err (!%p1092_p9)
}
  0x88   : > { %856 = dma.hbm_to_vmem [thread:$0]  (!%p1889_p0), %s1590_s26, 512, %s1592_s18, %s254_s27, %s1315_s28, %s1315_s28, %s1316_s17  }
  0x89   : > { %s1318_s19 = smov [#allocation7]   ;;  %s1096_s5 = scalar_lea.hbm %s1826_s2, 512 }
  0x8a   : > { %s315_s11 = sshll.u32 %s1318_s19, 4  ;;  %p1097_p5 = scmp.ne.s32.totalorder %s1826_s2, %s1096_s5  ;;  %s316_s11 = int_to_ptr.vmem [resolvable:$true] %s315_s11 }
  0x8b   : > { %p1103_p10 = scmp.lt.u32.totalorder %s1096_s5, %s1096_s5  ;;  %p1105_p13 = scmp.lt.u32.totalorder %s1096_s5, %s1826_s2 }
  0x8c   : > { %p1099_p1 = pnand %p1097_p5, %p1564_p6 }
  0x8d   : > { %p1106_p0 = por %p1105_p13, %p1103_p10 }
  0x8e   : > { %p1100_p7 = pneg %p1099_p1 }
  0x90   : > { %p1107_p11 = pnand %p1106_p0, %p1100_p7 }
  0x92   : > { %1110 = shalt.err (!%p1107_p11)
}
  0x93   : > { %s1111_s18 = scalar_lea.vmem %s316_s11, 512  ;;  %s1118_s26 = scalar_lea.vmem %s316_s11, 1024 }
  0x94   : > { %p1112_p12 = scmp.ne.s32.totalorder %s316_s11, %s1111_s18  ;;  %p1119_p3 = scmp.lt.s32.totalorder %s316_s11, %s316_s11 }
  0x95   : > { %p1120_p4 = scmp.lt.s32.totalorder %s1118_s26, %s1111_s18 }
  0x96   : > { %p1114_p8 = pnand %p1112_p12, %p1564_p6 }
  0x97   : > { %p1121_p9 = por %p1120_p4, %p1119_p3 }
  0x98   : > { %p1115_p2 = pneg %p1114_p8 }
  0x9a   : > { %p1122_p5 = pnand %p1121_p9, %p1115_p2 }
  0x9c   : > { %1125 = shalt.err (!%p1122_p5)
}
  0x9d   : > { %p1892_p1 = scmp.ne.s32.totalorder %s1883_s12, 0  ;;  %s1319_s25 = smov [#allocation10]  }
  0x9e   : > { %s365_s1 = sshll.u32 %s1319_s25, 4  ;;  %s1126_s9 = scalar_lea.hbm %s1828_s4, 512  ;;  %s366_s1 = int_to_ptr.vmem [resolvable:$true] %s365_s1 }
  0x9f   : > { %862 = dma.hbm_to_vmem [thread:$0]  (!%p1892_p1), %s1826_s2, 512, %s316_s11, %s1510_s13, %s1315_s28, %s1315_s28, %s1316_s17  }
  0xa0   : > { %p1127_p7 = scmp.ne.s32.totalorder %s1828_s4, %s1126_s9  ;;  %p1133_p0 = scmp.lt.u32.totalorder %s1126_s9, %s1126_s9 }
  0xa1   : > { %p1135_p11 = scmp.lt.u32.totalorder %s1126_s9, %s1828_s4 }
  0xa2   : > { %p1129_p10 = pnand %p1127_p7, %p1564_p6 }
  0xa3   : > { %p1136_p12 = por %p1135_p11, %p1133_p0 }
  0xa4   : > { %p1130_p13 = pneg %p1129_p10 }
  0xa6   : > { %p1137_p8 = pnand %p1136_p12, %p1130_p13 }
  0xa8   : > { %1140 = shalt.err (!%p1137_p8)
}
  0xa9   : > { %s1141_s13 = scalar_lea.vmem %s366_s1, 512  ;;  %s1148_s11 = scalar_lea.vmem %s366_s1, 1024 }
  0xaa   : > { %p1142_p2 = scmp.ne.s32.totalorder %s366_s1, %s1141_s13  ;;  %p1149_p9 = scmp.lt.s32.totalorder %s366_s1, %s366_s1 }
  0xab   : > { %p1150_p5 = scmp.lt.s32.totalorder %s1148_s11, %s1141_s13 }
  0xac   : > { %p1144_p3 = pnand %p1142_p2, %p1564_p6 }
  0xad   : > { %p1151_p1 = por %p1150_p5, %p1149_p9 }
  0xae   : > { %p1145_p4 = pneg %p1144_p3 }
  0xb0   : > { %p1152_p7 = pnand %p1151_p1, %p1145_p4 }
  0xb2   : > { %1155 = shalt.err (!%p1152_p7)
}
  0xb3   : > { %p1893_p10 = scmp.ne.s32.totalorder %s1883_s12, 0  ;;  %p1894_p13 = scmp.ne.s32.totalorder %s1884_s7, 0 }
  0xb4   : > { %s379_s15 = sand.u32 (!%p1894_p13), 1, %s1287_s24   ;;  %p1895_p6 = scmp.ne.s32.totalorder (!%p1894_p13), %s1870_s16, 0 }
  0xb5   : > { %868 = dma.hbm_to_vmem [thread:$0]  (!%p1893_p10), %s1828_s4, 512, %s366_s1, %s1554_s29, %s1315_s28, %s1315_s28, %s1316_s17  }
  0xb6   : > { %377 = sbr.rel (%p1894_p13) target bundleno = 300 (0x12c), region = 40  ;;  %s819_s26 = sshll.u32 (!%p1894_p13), %s379_s15, 5 }
  0xb7   : > { %s380_s27 = scalar_lea.sflag (!%p1894_p13), [#allocation3], %s379_s15  ;;  %s1670_s20 = scalar_lea.vmem (!%p1894_p13), [#allocation2], %s819_s26 }
  0xbd   : > { %1241 = dma.done.wait (%p1895_p6), %s380_s27, 512  }
  0xbe   : > { %1243 = vsyncadd (%p1895_p6), %s380_s27, 4294966784  ;;  %s388_s12 = sand.u32 1, %s1418_s6   ;;  %s820_s25 = sshll.u32 %s379_s15, 3 }
  0xbf   : > { %s389_s29 = scalar_lea.sflag [#allocation6], %s388_s12  ;;  %s1677_s28 = scalar_lea.vmem [#allocation5], %s820_s25 }
  0xc0   : > { %1245 = dma.done.wait (%p1895_p6), %s389_s29, 128  }
  0xc1   : > { %1247 = vsyncadd (%p1895_p6), %s389_s29, 4294967168  ;;  %s399_s7 = sand.u32 1, %s1279_s22   ;;  %p1896_p1 = scmp.ne.s32.totalorder %s1872_s23, 0 }
  0xc2   : > { %s821_s17 = sshll.u32 %s399_s7, 5 }
  0xc3   : > { %s1684_s1 = scalar_lea.vmem [#allocation7], %s821_s17 }
  0xc4   : > { %1249 = dma.done.wait (%p1896_p1), %s389_s29, 512  }
  0xc5   : > { %1251 = vsyncadd (%p1896_p1), %s389_s29, 4294966784  ;;  %s407_s6 = scalar_lea.sflag [#allocation9], %s388_s12  ;;  %s1690_s19 = scalar_lea.vmem [#allocation8], %s821_s17 }
  0xc6   : > { %1253 = dma.done.wait (%p1896_p1), %s407_s6, 1024  }
  0xc7   : > { %1255 = vsyncadd (%p1896_p1), %s407_s6, 4294966272  ;;  %s1897_s16 = sld [smem:[#allocation18_spill]]  ;;  %s1898_s21 = sld [smem:[#allocation22_spill]] }
  0xc8   : > { %s1899_s9 = sld [smem:[#allocation21_spill]]  ;;  %s1703_s13 = scalar_lea.vmem [#allocation10], %s821_s17 }
  0xcd   : > { %s463_s5 = sand.u32 1, %s1897_s16   ;;  %s825_s8 = sshll.u32 %s1898_s21, 1 }
  0xce   : > { %s824_s30 = sshll.u32 %s463_s5, 3  ;;  %s1701_s10 = sadd.s32 %s1899_s9, %s825_s8 }
  0xcf   : > { %s1705_s11 = scalar_lea.vmem [#allocation11], %s824_s30  ;;  %p826_p0 = scmp.ne.s32.totalorder %s1899_s9, 0 }
  0xd0   : > { %v1320_v0 = vmov (!%p826_p0), 0.0  }
  0xd1   : > { %495 = sbr.rel (%p826_p0) target bundleno = 216 (0xd8), region = 64  ;;  %496 = vst [vmem:[%s1705_s11] sm:$0xff] (!%p826_p0), %v1320_v0 }
  0xd8 PF: > { %p827_p11 = scmp.ge.s32.totalorder %s1701_s10, 4 }
  0xd9   : > { %v501_v1 = vld [vmem:[%s1670_s20] sm:$0xff] (!%p827_p11)  ;;  %v502_v2 = vld [vmem:[%s1670_s20 + $0x8] sm:$0xff] (!%p827_p11)  ;;  %v503_v3 = vld [vmem:[%s1670_s20 + $0x10] sm:$0xff] (!%p827_p11) }
  0xda   : > { %500 = sbr.rel (%p827_p11) target bundleno = 244 (0xf4), region = 68  ;;  %990 = vlog2.f32 (!%p827_p11), %v501_v1  ;;  %v504_v4 = vld [vmem:[%s1670_s20 + $0x18] sm:$0xff] (!%p827_p11)  ;;  %v505_v5 = vld [vmem:[%s1677_s28] sm:$0xff] (!%p827_p11) }
  0xdb   : > { %992 = vlog2.f32 (!%p827_p11), %v502_v2  ;;  %v506_v6 = vunpack.c.0.s8 (!%p827_p11), %v505_v5  ;;  %v507_v8 = vunpack.c.1.s8 (!%p827_p11), %v505_v5  ;;  %v508_v11 = vunpack.c.2.s8 (!%p827_p11), %v505_v5  ;;  %v530_v28 = vld [vmem:[%s1705_s11] sm:$0xff] (!%p827_p11) }
  0xdc   : > { %994 = vlog2.f32 (!%p827_p11), %v503_v3  ;;  %v509_v12 = vunpack.c.3.s8 (!%p827_p11), %v505_v5 }
  0xdd   : > { %996 = vlog2.f32 (!%p827_p11), %v504_v4  ;;  %vm510_vm0 = vcmp.ne.s32.totalorder (!%p827_p11), %v506_v6, 0  ;;  %vm511_vm1 = vcmp.ne.s32.totalorder (!%p827_p11), %v507_v8, 0  ;;  %vm512_vm2 = vcmp.ne.s32.totalorder (!%p827_p11), %v508_v11, 0 }
  0xde   : > { %vm513_vm3 = vcmp.ne.s32.totalorder (!%p827_p11), %v509_v12, 0 }
  0xe4   : > { %v991_v7 = vpop.eup %990 }
  0xe5   : > { %v515_v9 = vmul.f32 0.6931472, %v991_v7  ;;  %v993_v10 = vpop.eup %992 }
  0xe6   : > { %v517_v13 = vmul.f32 0.6931472, %v993_v10  ;;  %v995_v15 = vpop.eup %994 }
  0xe7   : > { %v522_v14 = vsub.f32 0.0, %v515_v9  ;;  %v997_v16 = vpop.eup %996  ;;  %v519_v17 = vmul.f32 0.6931472, %v995_v15 }
  0xe8   : > { %v523_v18 = vsub.f32 0.0, %v517_v13  ;;  %v521_v20 = vmul.f32 0.6931472, %v997_v16 }
  0xe9   : > { %v526_v19 = vsel %vm510_vm0, %v522_v14, 0.0  ;;  %v524_v21 = vsub.f32 0.0, %v519_v17 }
  0xea   : > { %v527_v22 = vsel %vm511_vm1, %v523_v18, 0.0  ;;  %v525_v23 = vsub.f32 0.0, %v521_v20 }
  0xeb   : > { %v531_v24 = vadd.f32 %v527_v22, %v526_v19  ;;  %v528_v25 = vsel %vm512_vm2, %v524_v21, 0.0 }
  0xec   : > { %v529_v26 = vsel %vm513_vm3, %v525_v23, 0.0 }
  0xed   : > { %v532_v27 = vadd.f32 %v531_v24, %v528_v25 }
  0xef   : > { %v533_v29 = vadd.f32 %v532_v27, %v529_v26 }
  0xf1   : > { %v534_v30 = vadd.f32 %v533_v29, %v530_v28 }
  0xf3   : > { %535 = vst [vmem:[%s1705_s11] sm:$0xff] %v534_v30 }
  0xf4 PF: > { %p828_p12 = scmp.ge.s32.totalorder %s1701_s10, 1 }
  0xf5   : > { %v540_v31 = vld [vmem:[%s1684_s1] sm:$0xff] (!%p828_p12)  ;;  %v541_v32 = vld [vmem:[%s1684_s1 + $0x8] sm:$0xff] (!%p828_p12)  ;;  %v542_v33 = vld [vmem:[%s1684_s1 + $0x10] sm:$0xff] (!%p828_p12) }
  0xf6   : > { %539 = sbr.rel (%p828_p12) target bundleno = 273 (0x111), region = 72  ;;  %v543_v34 = vld [vmem:[%s1684_s1 + $0x18] sm:$0xff] (!%p828_p12)  ;;  %998 = vlog2.f32 (!%p828_p12), %v540_v31  ;;  %v562_v35 = vld [vmem:[%s1690_s19] sm:$0xff] (!%p828_p12)  ;;  %v563_v36 = vld [vmem:[%s1690_s19 + $0x8] sm:$0xff] (!%p828_p12) }
  0xf7   : > { %1000 = vlog2.f32 (!%p828_p12), %v541_v32  ;;  %v564_v37 = vld [vmem:[%s1690_s19 + $0x10] sm:$0xff] (!%p828_p12)  ;;  %v565_v38 = vld [vmem:[%s1690_s19 + $0x18] sm:$0xff] (!%p828_p12)  ;;  %v566_v39 = vld [vmem:[%s1703_s13] sm:$0xff] (!%p828_p12) }
  0xf8   : > { %1002 = vlog2.f32 (!%p828_p12), %v542_v33  ;;  %v567_v40 = vld [vmem:[%s1703_s13 + $0x8] sm:$0xff] (!%p828_p12)  ;;  %v568_v41 = vld [vmem:[%s1703_s13 + $0x10] sm:$0xff] (!%p828_p12)  ;;  %v569_v42 = vld [vmem:[%s1703_s13 + $0x18] sm:$0xff] (!%p828_p12)  ;;  %v570_v43 = vsub.f32 (!%p828_p12), %v562_v35, %v566_v39 }
  0xf9   : > { %1004 = vlog2.f32 (!%p828_p12), %v543_v34  ;;  %v571_v44 = vsub.f32 (!%p828_p12), %v563_v36, %v567_v40  ;;  %v572_v45 = vsub.f32 (!%p828_p12), %v564_v37, %v568_v41  ;;  %v573_v46 = vsub.f32 (!%p828_p12), %v565_v38, %v569_v42 }
  0xfa   : > { %v574_v47 = vand.u32 (!%p828_p12), 2147483647, %v570_v43  ;;  %v582_v50 = vmul.f32 (!%p828_p12), 0.5, %v570_v43  ;;  %v556_v22 = vld [vmem:[%s1705_s11] sm:$0xff] (!%p828_p12) }
  0xfb   : > { %v575_v48 = vand.u32 (!%p828_p12), 2147483647, %v571_v44  ;;  %v576_v49 = vand.u32 (!%p828_p12), 2147483647, %v572_v45  ;;  %v583_v51 = vmul.f32 (!%p828_p12), 0.5, %v571_v44  ;;  %v584_v52 = vmul.f32 (!%p828_p12), 0.5, %v572_v45 }
  0xfc   : > { %v577_v53 = vand.u32 (!%p828_p12), 2147483647, %v573_v46  ;;  %vm1730_vm4 = vcmp.lt.f32.partialorder (!%p828_p12), %v574_v47, 1.0  ;;  %v585_v56 = vmul.f32 (!%p828_p12), 0.5, %v573_v46  ;;  %v586_v57 = vmul.f32 (!%p828_p12), %v582_v50, %v570_v43 }
  0xfd   : > { %vm1734_vm5 = vcmp.lt.f32.partialorder %v575_v48, 1.0  ;;  %v587_v58 = vmul.f32 %v583_v51, %v571_v44  ;;  %v588_v59 = vmul.f32 %v584_v52, %v572_v45  ;;  %v829_v60 = vadd.f32 -0.5, %v574_v47 }
  0xfe   : > { %v830_v61 = vadd.f32 -0.5, %v575_v48  ;;  %v831_v62 = vadd.f32 -0.5, %v576_v49  ;;  %vm1738_vm6 = vcmp.lt.f32.partialorder %v576_v49, 1.0  ;;  %v589_v7 = vmul.f32 %v585_v56, %v573_v46 }
  0xff   : > { %v594_v3 = vsel %vm1730_vm4, %v586_v57, %v829_v60  ;;  %v832_v12 = vadd.f32 -0.5, %v577_v53  ;;  %vm581_vm7 = vcmp.lt.f32.partialorder %v577_v53, 1.0 }
 0x100   : > { %v999_v63 = vpop.eup %998  ;;  %v595_v4 = vsel %vm1734_vm5, %v587_v58, %v830_v61  ;;  %v596_v13 = vsel %vm1738_vm6, %v588_v59, %v831_v62 }
 0x101   : > { %v1001_v1 = vpop.eup %1000  ;;  %v545_v2 = vmul.f32 0.6931472, %v999_v63  ;;  %v599_v8 = vadd.f32 %v595_v4, %v594_v3  ;;  %v597_v20 = vsel %vm581_vm7, %v589_v7, %v832_v12 }
 0x102   : > { %v1003_v5 = vpop.eup %1002  ;;  %v547_v6 = vmul.f32 0.6931472, %v1001_v1 }
 0x103   : > { %v1005_v9 = vpop.eup %1004  ;;  %v549_v10 = vmul.f32 0.6931472, %v1003_v5  ;;  %v552_v11 = vsub.f32 0.0, %v545_v2  ;;  %v600_v19 = vadd.f32 %v599_v8, %v596_v13 }
 0x104   : > { %v551_v14 = vmul.f32 0.6931472, %v1005_v9  ;;  %v553_v15 = vsub.f32 0.0, %v547_v6 }
 0x105   : > { %v554_v16 = vsub.f32 0.0, %v549_v10  ;;  %v601_v24 = vadd.f32 %v600_v19, %v597_v20 }
 0x106   : > { %v555_v17 = vsub.f32 0.0, %v551_v14  ;;  %v557_v18 = vadd.f32 %v553_v15, %v552_v11 }
 0x108   : > { %v558_v21 = vadd.f32 %v557_v18, %v554_v16 }
 0x10a   : > { %v559_v23 = vadd.f32 %v558_v21, %v555_v17 }
 0x10c   : > { %v560_v25 = vadd.f32 %v559_v23, %v556_v22 }
 0x10e   : > { %v602_v26 = vadd.f32 %v601_v24, %v560_v25 }
 0x110   : > { %603 = vst [vmem:[%s1705_s11] sm:$0xff] %v602_v26 }
 0x111 PF: > { %s1906_s23 = sld [smem:[#allocation22_spill]]  ;;  %s1908_s18 = sld [smem:[#allocation30_spill]] }
 0x112   : > { %s1909_s20 = sld [smem:[#allocation33_spill]]  ;;  %s618_s29 = sshll.u32 %s1705_s11, 4  ;;  %s619_s29 = int_to_ptr.vmem [resolvable:$true] %s618_s29 }
 0x113   : > { %s605_s28 = scalar_lea.sflag [#allocation4], %s463_s5  ;;  %s1156_s7 = scalar_lea.vmem %s619_s29, 128 }
 0x114   : > { %p1157_p8 = scmp.ne.s32.totalorder %s619_s29, %s1156_s7  ;;  %s1321_s17 = smov [#allocation11]  }
 0x115   : > { %s1160_s1 = sshll.u32 %s1321_s17, 4  ;;  %s1161_s1 = int_to_ptr.vmem [resolvable:$false] %s1160_s1 }
 0x116   : > { %s1162_s6 = scalar_lea.vmem %s1161_s1, 256  ;;  %p1163_p9 = scmp.lt.s32.totalorder %s619_s29, %s1161_s1 }
 0x117   : > { %s834_s15 = sshll.u32 %s1906_s23, 7  ;;  %p1911_p2 = scmp.ne.s32.totalorder %s1908_s18, 0 }
 0x118   : > { %s1910_s12 = smov %s1909_s20  ;;  %s1754_s25 = scalar_lea.hbm %s1909_s20, %s834_s15 }
 0x119   : > { %p1158_p3 = pnand %p1157_p8, %p1911_p2  ;;  %p1164_p5 = scmp.lt.s32.totalorder %s1162_s6, %s1156_s7 }
 0x11b   : > { %p1159_p4 = pneg %p1158_p3  ;;  %p1165_p7 = por %p1164_p5, %p1163_p9 }
 0x11d   : > { %p1166_p10 = pnand %p1165_p7, %p1159_p4 }
 0x11f   : > { %1169 = shalt.err (!%p1166_p10)
}
 0x120   : > { %s1170_s19 = scalar_lea.hbm %s1754_s25, 128  ;;  %s1174_s9 = scalar_lea.hbm %s1910_s12, 256 }
 0x121   : > { %p1171_p13 = scmp.ne.s32.totalorder %s1754_s25, %s1170_s19  ;;  %p1175_p0 = scmp.lt.u32.totalorder %s1754_s25, %s1910_s12 }
 0x122   : > { %p1176_p11 = scmp.lt.u32.totalorder %s1174_s9, %s1170_s19  ;;  %p1178_p8 = scmp.lt.u32.totalorder %s1170_s19, %s1754_s25 }
 0x123   : > { %p1172_p6 = pnand %p1171_p13, %p1911_p2 }
 0x124   : > { %p1177_p12 = por %p1176_p11, %p1175_p0 }
 0x125   : > { %p1173_p1 = pneg %p1172_p6 }
 0x126   : > { %p1179_p3 = por %p1178_p8, %p1177_p12 }
 0x128   : > { %p1180_p4 = pnand %p1179_p3, %p1173_p1 }
 0x12a   : > { %1183 = shalt.err (!%p1180_p4)
}
 0x12b   : > { %851 = dma.vmem_to_hbm [thread:$0]  (%p1911_p2), %s619_s29, 128, %s1754_s25, %s605_s28  }
 0x12c PF: > { %s1912_s8 = sld [smem:[#allocation25_spill]]  ;;  %s1913_s10 = sld [smem:[#allocation17_spill]] }
 0x12d   : > { %s1914_s13 = sld [smem:[#allocation31_spill]] }
 0x132   : > { %p874_p9 = scmp.ge.s32.totalorder %s1912_s8, 2  ;;  %s630_s11 = sand.u32 1, %s1913_s10  }
 0x133   : > { %p1915_p5 = scmp.ne.s32.totalorder %s1914_s13, 0  ;;  %s631_s23 = scalar_lea.sflag [#allocation4], %s630_s11 }
 0x135   : > { %p870_p7 = pnand %p874_p9, %p1915_p5 }
 0x137   : > { %1257 = dma.done.wait (!%p870_p7), %s631_s23, 128  }
 0x138   : > { %1259 = vsyncadd (!%p870_p7), %s631_s23, 4294967168  ;;  %s27_s30 = sadd.s32 1, %s1912_s8   ;;  %s1917_s18 = sld [smem:[#allocation18_spill]] }
 0x139   : > { %p1781_p10 = scmp.ge.s32.totalorder %s27_s30, 6   ;;  %s1918_s19 = sld [smem:[#allocation19_spill]] }
 0x13a   : > { %s1919_s20 = sld [smem:[#allocation28_spill]]  ;;  %s1920_s15 = sld [smem:[#allocation20_spill]] }
 0x13b   : > { %s1921_s25 = sld [smem:[#allocation29_spill]]  ;;  %s1922_s26 = sld [smem:[#allocation23_spill]] }
 0x13c   : > { %s1923_s27 = sld [smem:[#allocation24_spill]]  ;;  %s1924_s28 = sld [smem:[#allocation26_spill]] }
 0x13d   : > { %s1925_s29 = sld [smem:[#allocation27_spill]]  ;;  %s1926_s21 = smov %s1279_s22 }
 0x13e   : > { %s1797_s22 = smov 0   ;;  %s1927_s23 = smov %s1287_s24 }
 0x13f   :  { %26 = sbr.rel (!%p1781_p10) target bundleno = 17 (0x11), region = 145 }
 0x140   : > { %s1928_s24 = smov %s1920_s15 }
 0x146   :  { %636 = vsyncpa [#allocation3], 1 }
 0x147   :  { %638 = vsyncpa [#allocation3 + $0x1], 1 }
 0x148   :  { %639 = vsyncpa [#allocation6], 1 }
 0x149   :  { %641 = vsyncpa [#allocation6 + $0x1], 1 }
 0x14a   :  { %642 = vsyncpa [#allocation9], 1 }
 0x14b   :  { %644 = vsyncpa [#allocation9 + $0x1], 1 }
 0x14c   :  { %645 = vsyncpa [#allocation4], 1 }
 0x14d   :  { %647 = vsyncpa [#allocation4 + $0x1], 1 }

</bundles_post_ra>
